<compile_context>
chip_gen: v5e
topology: v5e:2x2
jax: 0.10.0
libtpu: 0.0.40
codegen_flags: <defaults>
</compile_context>

<pallas_src>
import functools

import numpy as np
import jax
import jax.numpy as jnp
from jax.experimental import pallas as pl
from jax.experimental.pallas import tpu as pltpu

_BETA = 1.0                        # torch smooth_l1_loss default
_INV_BETA_HALF = 0.5 / _BETA       # precomputed: no vector divide in kernel
_LANES = 128                       # TPU vreg lane width
_MAX_BLOCK_ROWS = 2048             # 2048x128 f32 = 1 MiB per buffer
_MIN_SPLIT_ROWS = 1024             # split grid >= 2 blocks (v7x dual TC)
_PALLAS_MIN_ELEMS = 128 * 1024     # below this, fused XLA already at roofline


def _round_up(x, m):
    return (x + m - 1) // m * m


def _smooth_l1_neg(pred_f32, goal_f32):
    """-smooth_l1(pred, goal), reduction='none', beta=_BETA (f32 math)."""
    diff = pred_f32 - goal_f32
    abs_diff = jnp.abs(diff)
    quad = _INV_BETA_HALF * diff * diff
    lin = abs_diff - 0.5 * _BETA
    return -jnp.where(abs_diff < _BETA, quad, lin)


def _goal_reward_nomask_kernel(pred_ref, goal_ref, out_ref):
    pred = pred_ref[...].astype(jnp.float32)
    goal = goal_ref[...].astype(jnp.float32)
    out_ref[...] = _smooth_l1_neg(pred, goal).astype(out_ref.dtype)


def _goal_reward_mask_kernel(pred_ref, goal_ref, mask_ref, out_ref, *,
                             binary_mask):
    pred = pred_ref[...].astype(jnp.float32)
    goal = goal_ref[...].astype(jnp.float32)
    reward = _smooth_l1_neg(pred, goal)
    mask = mask_ref[...]
    if binary_mask:
        # int8 0/1 mask streamed at 1 B/elem -> select, no f32 upcast needed.
        reward = jnp.where(mask != 0, reward, jnp.zeros_like(reward))
    else:
        reward = reward * mask.astype(jnp.float32)
    out_ref[...] = reward.astype(out_ref.dtype)


def _pallas_goal_reward_flat(pred_flat, goal_flat, mask_flat, binary_mask,
                             out_dtype):
    """Elementwise smooth-L1 reward on a lane-dense (rows, 128) slab."""
    total = pred_flat.shape[0]
    pad = (-total) % _LANES          # only up to one 128-lane row of padding
    rows = (total + pad) // _LANES

    def to_slab(x):
        if pad:
            x = jnp.pad(x, (0, pad))   # only on ragged totals
        return x.reshape(rows, _LANES)

    operands = [to_slab(pred_flat), to_slab(goal_flat)]
    if mask_flat is None:
        kernel = _goal_reward_nomask_kernel
    else:
        operands.append(to_slab(mask_flat))
        kernel = functools.partial(_goal_reward_mask_kernel,
                                   binary_mask=binary_mask)

    # Block-row selection: big blocks to amortize per-step overhead, >= 2
    # blocks when there is enough work so both v7x TensorCores participate.
    if rows > _MAX_BLOCK_ROWS:
        block_rows = _MAX_BLOCK_ROWS
    elif rows >= _MIN_SPLIT_ROWS:
        block_rows = _round_up(pl.cdiv(rows, 2), 8)
    else:
        block_rows = rows             # single block == full dim (any rows ok)
    grid = (pl.cdiv(rows, block_rows),)   # partial last block handled by Pallas

    spec = pl.BlockSpec((block_rows, _LANES), lambda i: (i, 0))
    out = pl.pallas_call(
        kernel,
        out_shape=jax.ShapeDtypeStruct((rows, _LANES), out_dtype),
        grid=grid,
        in_specs=[spec] * len(operands),
        out_specs=spec,
        compiler_params=pltpu.CompilerParams(
            dimension_semantics=("parallel",),
        ),
    )(*operands)

    if pad:
        return out.reshape(-1)[:total]
    return out.reshape(-1)            # zero-copy: reshape only


@functools.partial(jax.jit, static_argnames=("look_ahead", "force_pallas"))
def goal_reward(traj_pred, goal, goal_mask=None, *, look_ahead=-1,
                force_pallas=False):
    """JAX/Pallas equivalent of GoalReward.forward (smooth_l1_loss)."""
    d = goal.shape[-1]
    # Glue: time-step selection and feature truncation (pure indexing).
    pred_slice = traj_pred[..., look_ahead, :d]

    if goal_mask is None:
        out_dtype = jnp.result_type(traj_pred.dtype, goal.dtype)
    else:
        out_dtype = jnp.result_type(traj_pred.dtype, goal.dtype,
                                    goal_mask.dtype)
    if not jnp.issubdtype(out_dtype, jnp.floating):
        out_dtype = jnp.float32

    mask = goal_mask
    binary_mask = False
    if mask is not None and mask.dtype == jnp.bool_:
        mask = mask.astype(jnp.int8)   # 1 B/elem stream; selected in-kernel
        binary_mask = True

    total = int(np.prod(goal.shape)) if goal.ndim else 1

    if force_pallas or total >= _PALLAS_MIN_ELEMS:
        out_flat = _pallas_goal_reward_flat(
            pred_slice.reshape(-1),
            goal.reshape(-1),
            None if mask is None else mask.reshape(-1),
            binary_mask,
            out_dtype)
        return out_flat.reshape(goal.shape)

    # Small problem: pallas_call launch/DMA overhead dominates -> let XLA fuse.
    rewards = _smooth_l1_neg(pred_slice.astype(jnp.float32),
                             goal.astype(jnp.float32))
    if mask is not None:
        if binary_mask:
            rewards = jnp.where(mask != 0, rewards, jnp.zeros_like(rewards))
        else:
            rewards = rewards * mask.astype(jnp.float32)
    return rewards.astype(out_dtype)


def _reference(traj_pred, goal, goal_mask, look_ahead=-1):
    """Pure-numpy reference of the PyTorch forward."""
    d = goal.shape[-1]
    pred = np.asarray(traj_pred)[..., look_ahead, :d].astype(np.float32)
    goal = np.asarray(goal).astype(np.float32)
    mask = np.asarray(goal_mask).astype(np.float32)
    diff = pred - goal
    ad = np.abs(diff)
    loss = np.where(ad < _BETA,
                    0.5 * diff * diff / _BETA,
                    ad - 0.5 * _BETA)
    return -loss * mask


if __name__ == "__main__":
    key = jax.random.PRNGKey(0)
    k1, k2, k3, k4, k5, k6, k7, k8 = jax.random.split(key, 8)

    # Small shapes consistent with the module:
    # (batch, agents, timesteps, pred feats), goal dims d.
    B, A, T, Dp, d = 2, 4, 8, 5, 2
    traj_pred = jax.random.normal(k1, (B, A, T, Dp), dtype=jnp.float32) * 3.0
    goal = jax.random.normal(k2, (B, A, d), dtype=jnp.float32) * 3.0
    goal_mask = (jax.random.uniform(k3, (B, A, d)) > 0.3).astype(jnp.float32)

    ref = _reference(np.array(traj_pred), np.array(goal), np.array(goal_mask))

    # 1) Forced Pallas path, float mask (multiply path) on a small shape.
    out = jax.block_until_ready(
        goal_reward(traj_pred, goal, goal_mask, force_pallas=True))
    np.testing.assert_allclose(np.array(out), ref, rtol=1e-5, atol=1e-5)

    # 2) Auto dispatch: small problem -> fused XLA fallback, same numbers.
    out_auto = jax.block_until_ready(goal_reward(traj_pred, goal, goal_mask))
    np.testing.assert_allclose(np.array(out_auto), ref, rtol=1e-5, atol=1e-5)

    # 3) goal_mask=None -> specialized 2-input Pallas kernel.
    out_nm = jax.block_until_ready(
        goal_reward(traj_pred, goal, None, force_pallas=True))
    ref_nm = _reference(np.array(traj_pred), np.array(goal),
                        np.ones((B, A, d), np.float32))
    np.testing.assert_allclose(np.array(out_nm), ref_nm, rtol=1e-5, atol=1e-5)

    # 4) Boolean mask -> int8 stream + in-kernel select path.
    bool_mask = jax.random.uniform(k4, (B, A, d)) > 0.3
    out_bm = jax.block_until_ready(
        goal_reward(traj_pred, goal, bool_mask, force_pallas=True))
    ref_bm = _reference(np.array(traj_pred), np.array(goal),
                        np.array(bool_mask))
    np.testing.assert_allclose(np.array(out_bm), ref_bm, rtol=1e-5, atol=1e-5)

    # 5) Larger shape -> auto Pallas path, zero-copy slab (total % 128 == 0),
    #    grid split into 2 "parallel" blocks, non-default look_ahead.
    B2, A2, T2, Dp2, d2 = 8, 1024, 4, 20, 16      # total = 131072 elements
    tp2 = jax.random.normal(k5, (B2, A2, T2, Dp2), dtype=jnp.float32) * 2.0
    g2 = jax.random.normal(k6, (B2, A2, d2), dtype=jnp.float32) * 2.0
    m2 = (jax.random.uniform(k7, (B2, A2, d2)) > 0.5).astype(jnp.float32)
    out2 = jax.block_until_ready(goal_reward(tp2, g2, m2, look_ahead=1))
    ref2 = _reference(np.array(tp2), np.array(g2), np.array(m2), look_ahead=1)
    np.testing.assert_allclose(np.array(out2), ref2, rtol=1e-5, atol=1e-5)

    # 6) Ragged total (not a multiple of 128) with rows > one 2048-row block:
    #    exercises minimal tail padding + partial last grid block.
    B3, A3, T3, Dp3, d3 = 1, 2600, 3, 115, 113    # total = 293800 elements
    tp3 = jax.random.normal(k8, (B3, A3, T3, Dp3), dtype=jnp.float32)
    g3 = jax.random.normal(k1, (B3, A3, d3), dtype=jnp.float32)
    out3 = jax.block_until_ready(goal_reward(tp3, g3, None))
    ref3 = _reference(np.array(tp3), np.array(g3),
                      np.ones((B3, A3, d3), np.float32))
    np.testing.assert_allclose(np.array(out3), ref3, rtol=1e-5, atol=1e-5)

    print("KERNEL_OK")
</pallas_src>

<mosaic_0001>
module attributes {stable_mosaic.version = 11 : i64} {
  func.func @_goal_reward_mask_kernel(%arg0: i32, %arg1: memref<1x128xf32, #tpu.memory_space<vmem>>, %arg2: memref<1x128xf32, #tpu.memory_space<vmem>>, %arg3: memref<1x128xf32, #tpu.memory_space<vmem>>, %arg4: memref<1x128xf32, #tpu.memory_space<vmem>>) attributes {dimension_semantics = [#tpu.dimension_semantics<parallel>], iteration_bounds = array<i64: 1>, scalar_prefetch = 0 : i64, scratch_operands = 0 : i64, tpu.core_type = #tpu.core_type<tc>, window_params = [{transform_indices = @transform_0, window_bounds = array<i64: 1, 128>}, {transform_indices = @transform_1, window_bounds = array<i64: 1, 128>}, {transform_indices = @transform_2, window_bounds = array<i64: 1, 128>}, {transform_indices = @transform_3, window_bounds = array<i64: 1, 128>}]} {
    %c0 = arith.constant 0 : index
    %c0_0 = arith.constant 0 : index
    %0 = vector.load %arg1[%c0, %c0_0] : memref<1x128xf32, #tpu.memory_space<vmem>>, vector<1x128xf32>
    %c0_1 = arith.constant 0 : index
    %c0_2 = arith.constant 0 : index
    %1 = vector.load %arg2[%c0_1, %c0_2] : memref<1x128xf32, #tpu.memory_space<vmem>>, vector<1x128xf32>
    %2 = arith.subf %0, %1 : vector<1x128xf32>
    %3 = math.absf %2 : vector<1x128xf32>
    %cst = arith.constant 5.000000e-01 : f32
    %4 = vector.broadcast %cst : f32 to vector<1x128xf32>
    %5 = arith.mulf %4, %2 : vector<1x128xf32>
    %6 = arith.mulf %5, %2 : vector<1x128xf32>
    %cst_3 = arith.constant 5.000000e-01 : f32
    %7 = vector.broadcast %cst_3 : f32 to vector<1x128xf32>
    %8 = arith.subf %3, %7 : vector<1x128xf32>
    %cst_4 = arith.constant 1.000000e+00 : f32
    %9 = vector.broadcast %cst_4 : f32 to vector<1x128xf32>
    %10 = arith.cmpf olt, %3, %9 : vector<1x128xf32>
    %11 = arith.select %10, %6, %8 : vector<1x128xi1>, vector<1x128xf32>
    %cst_5 = arith.constant 0.000000e+00 : f32
    %12 = vector.broadcast %cst_5 : f32 to vector<1x128xf32>
    %13 = arith.subf %12, %11 : vector<1x128xf32>
    %c0_6 = arith.constant 0 : index
    %c0_7 = arith.constant 0 : index
    %14 = vector.load %arg3[%c0_6, %c0_7] : memref<1x128xf32, #tpu.memory_space<vmem>>, vector<1x128xf32>
    %15 = arith.mulf %13, %14 : vector<1x128xf32>
    %c0_8 = arith.constant 0 : index
    %c0_9 = arith.constant 0 : index
    %16 = vector.load %arg4[%c0_8, %c0_9] : memref<1x128xf32, #tpu.memory_space<vmem>>, vector<1x128xf32>
    tpu.vector_store %arg4[%c0_8, %c0_9], %15 {strides = array<i32>} : memref<1x128xf32, #tpu.memory_space<vmem>>, vector<1x128xf32>,
    return
  }
  func.func @transform_0(%arg0: i32) -> (i32, i32) {
    %c0_i32 = arith.constant 0 : i32
    %c0_i32_0 = arith.constant 0 : i32
    return %arg0, %c0_i32 : i32, i32
  }
  func.func @transform_1(%arg0: i32) -> (i32, i32) {
    %c0_i32 = arith.constant 0 : i32
    %c0_i32_0 = arith.constant 0 : i32
    return %arg0, %c0_i32 : i32, i32
  }
  func.func @transform_2(%arg0: i32) -> (i32, i32) {
    %c0_i32 = arith.constant 0 : i32
    %c0_i32_0 = arith.constant 0 : i32
    return %arg0, %c0_i32 : i32, i32
  }
  func.func @transform_3(%arg0: i32) -> (i32, i32) {
    %c0_i32 = arith.constant 0 : i32
    %c0_i32_0 = arith.constant 0 : i32
    return %arg0, %c0_i32 : i32, i32
  }
}

</mosaic_0001>

<bundles_post_ra>
// kernel: squeeze.1
= control target key start
LH: loop header
LB: loop body
LE: loop exit
PB: predicated region body
PF: predicated region fallthrough
CT: control target
= control target key end

     0   :  { %vm11_vm0 = vcmask 15360   ;;  %s70_s10 = smov 10   ;;  %s71_s11 = smov 6   ;;  %vm17_vm1 = vcmask 130160   ;;  %vm23_vm2 = vcmask 113760   ;;  %vm29_vm3 = vcmask 97360   ;;  %s95_s0 = inlined_call_operand.vmem [shape: f32[2,4,1,2], index: 0, kind: input, shape index: {}]   ;;  %s96_s1 = inlined_call_operand.vmem [shape: f32[16], index: 1, kind: output, shape index: {}]  }
   0x1   :  { %v61_v0 = vld [vmem:[%s95_s0 + $0x4] sm:$0xf]  ;;  %v8_v1 = vld [vmem:[%s95_s0] sm:$0xf]  ;;  %s69_s0 = smov 14   ;;  %s72_s12 = smov 12  }
   0x2   :  { %7 = vst [vmem:[#allocation1 + $0x8] sm:$0xf] %v61_v0  ;;  %s73_s13 = smov 8   ;;  %s74_s14 = smov 4   ;;  %vm35_vm4 = vcmask 80960   ;;  %vm41_vm5 = vcmask 64560  }
   0x3   :  { %9 = vst [vmem:[#allocation1] sm:$0xf] %v8_v1  ;;  %s75_s15 = smov 2   ;;  %vm47_vm6 = vcmask 48160   ;;  %vm53_vm7 = vcmask 31760  }
   0x9   :  { %v14_v2 = vld [vmem:[#allocation1 + $0xb] sm:$0x1]   ;;  %v26_v3 = vld [vmem:[#allocation1 + $0x9] sm:$0x1]   ;;  %v20_v6 = vld [vmem:[#allocation1 + $0xa] sm:$0x1]  }
   0xa   :  { %15 = vrot.lane.b32.xlu0 %v14_v2, %s69_s0  ;;  %27 = vrot.lane.b32.xlu1 %v26_v3, %s70_s10  ;;  %v38_v4 = vld [vmem:[#allocation1 + $0x3] sm:$0x1]   ;;  %v10_v5 = vld [vmem:[#allocation1] sm:$0x1]   ;;  %v32_v7 = vld [vmem:[#allocation1 + $0x8] sm:$0x1]  }
   0xb   :  { %39 = vrot.lane.b32.xlu2 %v38_v4, %s71_s11  ;;  %12 = vst.msk [vmem:[#allocation0] sm:$0x1] %vm11_vm0, %v10_v5   ;;  %v44_v8 = vld [vmem:[#allocation1 + $0x2] sm:$0x1]   ;;  %v50_v9 = vld [vmem:[#allocation1 + $0x1] sm:$0x1]  }
  0x12   :  { %21 = vrot.lane.b32.xlu0 %v20_v6, %s72_s12  ;;  %33 = vrot.lane.b32.xlu1 %v32_v7, %s73_s13 }
  0x13   :  { %45 = vrot.lane.b32.xlu2 %v44_v8, %s74_s14 }
  0x1a   :  { %51 = vrot.lane.b32.xlu0 %v50_v9, %s75_s15 }
  0x65   :  { %v40_v10 = vpop.permute.xlu2 %39  }
  0x6d   :  { %v46_v11 = vpop.permute.xlu2 %45  }
  0x7c   :  { %v16_v12 = vpop.permute.xlu0 %15   ;;  %v28_v13 = vpop.permute.xlu1 %27  }
  0x7d   :  { %18 = vst.msk [vmem:[#allocation0] sm:$0x1] %vm17_vm1, %v16_v12  }
  0x84   :  { %v22_v14 = vpop.permute.xlu0 %21   ;;  %v34_v15 = vpop.permute.xlu1 %33  }
  0x85   :  { %24 = vst.msk [vmem:[#allocation0] sm:$0x1] %vm23_vm2, %v22_v14  }
  0x86   :  { %30 = vst.msk [vmem:[#allocation0] sm:$0x1] %vm29_vm3, %v28_v13  }
  0x87   :  { %36 = vst.msk [vmem:[#allocation0] sm:$0x1] %vm35_vm4, %v34_v15  }
  0x88   :  { %42 = vst.msk [vmem:[#allocation0] sm:$0x1] %vm41_vm5, %v40_v10  }
  0x89   :  { %48 = vst.msk [vmem:[#allocation0] sm:$0x1] %vm47_vm6, %v46_v11  }
  0x8c   :  { %v52_v16 = vpop.permute.xlu0 %51  }
  0x8d   :  { %54 = vst.msk [vmem:[#allocation0] sm:$0x1] %vm53_vm7, %v52_v16  }
  0x94   :  { %v57_v17 = vld [vmem:[#allocation0] sm:$0x1] }
  0x95   :  { %60 = vst [vmem:[%s96_s1] sm:$0x1] %v57_v17 }

// kernel: goal_reward.1
= control target key start
LH: loop header
LB: loop body
LE: loop exit
PB: predicated region body
PF: predicated region fallthrough
CT: control target
= control target key end

     0   :  { %s64_s0 = inlined_call_operand.vmem [shape: f32[1,128], index: 0, kind: input, shape index: {}]   ;;  %s65_s1 = inlined_call_operand.vmem [shape: f32[1,128], index: 1, kind: input, shape index: {}]   ;;  %s66_s2 = inlined_call_operand.vmem [shape: f32[1,128], index: 2, kind: input, shape index: {}]   ;;  %s67_s3 = inlined_call_operand.vmem [shape: f32[1,128], index: 3, kind: output, shape index: {}]  }
   0x1   :  { %v14_v0 = vld [vmem:[%s64_s0] sm:$0x1] }
   0x2   :  { %v15_v1 = vld [vmem:[%s65_s1] sm:$0x1] }
   0x3   :  { %v16_v2 = vsub.f32 %v14_v0, %v15_v1  ;;  %v24_v8 = vld [vmem:[%s66_s2] sm:$0x1] }
   0x5   :  { %v17_v3 = vand.u32 2147483647, %v16_v2  ;;  %v18_v4 = vmul.f32 0.5, %v16_v2 }
   0x7   :  { %v19_v5 = vmul.f32 %v18_v4, %v16_v2  ;;  %v31_v6 = vadd.f32 -0.5, %v17_v3  ;;  %vm21_vm0 = vcmp.lt.f32.partialorder %v17_v3, 1.0 }
   0x9   :  { %v22_v7 = vsel %vm21_vm0, %v19_v5, %v31_v6 }
   0xa   :  { %v23_v9 = vsub.f32 0.0, %v22_v7 }
   0xc   :  { %v25_v10 = vmul.f32 %v24_v8, %v23_v9 }
   0xe   :  { %26 = vst [vmem:[%s67_s3] sm:$0x1] %v25_v10 }

</bundles_post_ra>
